<compile_context>
chip_gen: v7x
topology: tpu7x:2x2x1
jax: 0.10.0
libtpu: 0.0.40
codegen_flags: <defaults>
</compile_context>

<pallas_src>
import functools

import jax
import jax.numpy as jnp
from jax.experimental import pallas as pl
from jax.experimental.pallas import tpu as pltpu

_SUBLANE = 8


def _round_up(x, m):
    return ((x + m - 1) // m) * m


def _mlp_kernel(x_ref, w1_ref, b1_ref, w2_ref, b2_ref, o_ref):
    # Linear(obs -> hidden) + ReLU, then Linear(hidden -> n_actions) + ReLU.
    # All in f32 (MXU matmul with f32 accumulation; bias + ReLU on the VPU).
    x = x_ref[...]
    h = jnp.dot(x, w1_ref[...], preferred_element_type=jnp.float32)
    h = jnp.maximum(h + b1_ref[...], 0.0)
    y = jnp.dot(h.astype(w2_ref.dtype), w2_ref[...],
                preferred_element_type=jnp.float32)
    y = jnp.maximum(y + b2_ref[...], 0.0)
    o_ref[...] = y.astype(o_ref.dtype)


def prepare_params(w1, b1, w2, b2, compute_dtype=jnp.float32):
    """One-time repack of PyTorch-layout params into kernel layout.

    w1: [hidden, obs]      (PyTorch (out, in)) -> [obs, hidden]
    w2: [n_actions, hidden]                    -> [hidden, n_actions]
    b1: [hidden]                               -> [1, hidden]     (f32)
    b2: [n_actions]                            -> [1, n_actions]  (f32)
    """
    w1_t = jnp.transpose(w1).astype(compute_dtype)        # [obs, hidden]
    b1_2d = b1.reshape(1, -1).astype(jnp.float32)         # [1, hidden]
    w2_t = jnp.transpose(w2).astype(compute_dtype)        # [hidden, n_actions]
    b2_2d = b2.reshape(1, -1).astype(jnp.float32)         # [1, n_actions]
    return w1_t, b1_2d, w2_t, b2_2d


def net_forward(x, w1_t, b1_2d, w2_t, b2_2d, *, block_b=1024, min_grid_steps=2):
    """Fused 2-layer MLP forward over a batch grid.

    x: [B, obs_size]; params from `prepare_params`.
    Returns [B, n_actions] in x's dtype.
    """
    B, obs = x.shape
    hidden = w1_t.shape[1]
    n_actions = w2_t.shape[1]

    # Single cast in the wrapper (usually a no-op), not per tile in the kernel.
    if x.dtype != w1_t.dtype:
        x = x.astype(w1_t.dtype)
    out_dtype = x.dtype

    # Batch tile: as large as possible (amortize ~0.35us/step grid overhead),
    # but keep >= min_grid_steps grid steps so v7x megacore gets both cores
    # busy.  Sublane-aligned (multiple of 8); grid handles the ragged tail.
    bt = min(block_b, _round_up(-(-B // min_grid_steps), _SUBLANE))
    bt = max(bt, _SUBLANE)
    grid = (pl.cdiv(B, bt),)

    itemsize = jnp.dtype(out_dtype).itemsize
    param_bytes = sum(int(a.size) * jnp.dtype(a.dtype).itemsize
                      for a in (w1_t, b1_2d, w2_t, b2_2d))
    cost = pl.CostEstimate(
        flops=2 * B * (obs * hidden + hidden * n_actions),
        transcendentals=0,
        bytes_accessed=int(B * obs * itemsize
                           + B * n_actions * itemsize
                           + param_bytes),
    )

    out = pl.pallas_call(
        _mlp_kernel,
        out_shape=jax.ShapeDtypeStruct((B, n_actions), out_dtype),
        grid=grid,
        in_specs=[
            pl.BlockSpec((bt, obs), lambda i: (i, 0)),        # x tile moves
            # Constant block indices -> weights/biases stay VMEM-resident
            # across all grid steps (only a few KB here, so the default
            # double-buffering of these operands is irrelevant).
            pl.BlockSpec((obs, hidden), lambda i: (0, 0)),
            pl.BlockSpec((1, hidden), lambda i: (0, 0)),
            pl.BlockSpec((hidden, n_actions), lambda i: (0, 0)),
            pl.BlockSpec((1, n_actions), lambda i: (0, 0)),
        ],
        # Output block's last dim equals the full array last dim (legal even
        # though n_actions < 128); 16x less HBM writeback than lane-padding.
        out_specs=pl.BlockSpec((bt, n_actions), lambda i: (i, 0)),
        compiler_params=pltpu.CompilerParams(
            dimension_semantics=("parallel",)),               # megacore on v7x
        cost_estimate=cost,
    )(x, w1_t, b1_2d, w2_t, b2_2d)

    return out


def _reference(x, w1, b1, w2, b2):
    h = jnp.maximum(x @ w1.T + b1, 0.0)
    return jnp.maximum(h @ w2.T + b2, 0.0)


if __name__ == "__main__":
    # Net(obs_size=16, hidden_size=32, n_actions=8), batched over 256 obs
    # (2 grid tiles) to exercise the pipelined / weight-resident path.
    batch, obs_size, hidden_size, n_actions = 256, 16, 32, 8

    key = jax.random.PRNGKey(0)
    kx, k1, kb1, k2, kb2 = jax.random.split(key, 5)

    x = jax.random.normal(kx, (batch, obs_size), dtype=jnp.float32)
    w1 = jax.random.uniform(k1, (hidden_size, obs_size), jnp.float32,
                            -1.0 / obs_size ** 0.5, 1.0 / obs_size ** 0.5)
    b1 = jax.random.uniform(kb1, (hidden_size,), jnp.float32,
                            -1.0 / obs_size ** 0.5, 1.0 / obs_size ** 0.5)
    w2 = jax.random.uniform(k2, (n_actions, hidden_size), jnp.float32,
                            -1.0 / hidden_size ** 0.5, 1.0 / hidden_size ** 0.5)
    b2 = jax.random.uniform(kb2, (n_actions,), jnp.float32,
                            -1.0 / hidden_size ** 0.5, 1.0 / hidden_size ** 0.5)

    # One-time param repack (outside the hot path).
    params = prepare_params(w1, b1, w2, b2)

    fwd = jax.jit(functools.partial(net_forward, block_b=1024))
    out = jax.block_until_ready(fwd(x, *params))

    ref = _reference(x, w1, b1, w2, b2)
    assert out.shape == (batch, n_actions)
    # f32 compute end-to-end -> tight tolerance vs the f32 reference.
    assert jnp.allclose(out, ref, atol=1e-4, rtol=1e-4), float(
        jnp.max(jnp.abs(out - ref)))

    print("KERNEL_OK")
</pallas_src>

<mosaic_0001>
module attributes {stable_mosaic.version = 11 : i64} {
  func.func @_mlp_kernel(%arg0: i32, %arg1: memref<128x16xf32, #tpu.memory_space<vmem>>, %arg2: memref<16x32xf32, #tpu.memory_space<vmem>>, %arg3: memref<1x32xf32, #tpu.memory_space<vmem>>, %arg4: memref<32x8xf32, #tpu.memory_space<vmem>>, %arg5: memref<1x8xf32, #tpu.memory_space<vmem>>, %arg6: memref<128x8xf32, #tpu.memory_space<vmem>>) attributes {dimension_semantics = [#tpu.dimension_semantics<parallel>], iteration_bounds = array<i64: 2>, scalar_prefetch = 0 : i64, scratch_operands = 0 : i64, tpu.core_type = #tpu.core_type<tc>, window_params = [{transform_indices = @transform_0, window_bounds = array<i64: 128, 16>}, {pipeline_mode = #tpu.pipeline_mode<synchronous>, transform_indices = @transform_1, window_bounds = array<i64: 16, 32>}, {pipeline_mode = #tpu.pipeline_mode<synchronous>, transform_indices = @transform_2, window_bounds = array<i64: 1, 32>}, {pipeline_mode = #tpu.pipeline_mode<synchronous>, transform_indices = @transform_3, window_bounds = array<i64: 32, 8>}, {pipeline_mode = #tpu.pipeline_mode<synchronous>, transform_indices = @transform_4, window_bounds = array<i64: 1, 8>}, {transform_indices = @transform_5, window_bounds = array<i64: 128, 8>}]} {
    %c0 = arith.constant 0 : index
    %c0_0 = arith.constant 0 : index
    %0 = vector.load %arg1[%c0, %c0_0] : memref<128x16xf32, #tpu.memory_space<vmem>>, vector<128x16xf32>
    %c0_1 = arith.constant 0 : index
    %c0_2 = arith.constant 0 : index
    %1 = vector.load %arg2[%c0_1, %c0_2] : memref<16x32xf32, #tpu.memory_space<vmem>>, vector<16x32xf32>
    %cst = arith.constant dense<0.000000e+00> : vector<128x32xf32>
    %2 = tpu.matmul %0, %1, %cst {dimension_numbers = #tpu.dot_dimension_numbers<[1], [0], [0], [1], [0, 0, 1, 1], [], []>} : vector<128x16xf32>, vector<16x32xf32>, vector<128x32xf32> -> vector<128x32xf32>
    %c0_3 = arith.constant 0 : index
    %c0_4 = arith.constant 0 : index
    %3 = vector.load %arg3[%c0_3, %c0_4] : memref<1x32xf32, #tpu.memory_space<vmem>>, vector<1x32xf32>
    %4 = vector.broadcast %3 : vector<1x32xf32> to vector<128x32xf32>
    %5 = arith.addf %2, %4 : vector<128x32xf32>
    %cst_5 = arith.constant 0.000000e+00 : f32
    %6 = vector.broadcast %cst_5 : f32 to vector<128x32xf32>
    %7 = arith.maximumf %5, %6 : vector<128x32xf32>
    %c0_6 = arith.constant 0 : index
    %c0_7 = arith.constant 0 : index
    %8 = vector.load %arg4[%c0_6, %c0_7] : memref<32x8xf32, #tpu.memory_space<vmem>>, vector<32x8xf32>
    %cst_8 = arith.constant dense<0.000000e+00> : vector<128x8xf32>
    %9 = tpu.matmul %7, %8, %cst_8 {dimension_numbers = #tpu.dot_dimension_numbers<[1], [0], [0], [1], [0, 0, 1, 1], [], []>} : vector<128x32xf32>, vector<32x8xf32>, vector<128x8xf32> -> vector<128x8xf32>
    %c0_9 = arith.constant 0 : index
    %c0_10 = arith.constant 0 : index
    %10 = vector.load %arg5[%c0_9, %c0_10] : memref<1x8xf32, #tpu.memory_space<vmem>>, vector<1x8xf32>
    %11 = vector.broadcast %10 : vector<1x8xf32> to vector<128x8xf32>
    %12 = arith.addf %9, %11 : vector<128x8xf32>
    %cst_11 = arith.constant 0.000000e+00 : f32
    %13 = vector.broadcast %cst_11 : f32 to vector<128x8xf32>
    %14 = arith.maximumf %12, %13 : vector<128x8xf32>
    %c0_12 = arith.constant 0 : index
    %c0_13 = arith.constant 0 : index
    %15 = vector.load %arg6[%c0_12, %c0_13] : memref<128x8xf32, #tpu.memory_space<vmem>>, vector<128x8xf32>
    tpu.vector_store %arg6[%c0_12, %c0_13], %14 {strides = array<i32>} : memref<128x8xf32, #tpu.memory_space<vmem>>, vector<128x8xf32>,
    return
  }
  func.func @transform_0(%arg0: i32) -> (i32, i32) {
    %c0_i32 = arith.constant 0 : i32
    %c0_i32_0 = arith.constant 0 : i32
    return %arg0, %c0_i32 : i32, i32
  }
  func.func @transform_1(%arg0: i32) -> (i32, i32) {
    %c0_i32 = arith.constant 0 : i32
    %c0_i32_0 = arith.constant 0 : i32
    %c0_i32_1 = arith.constant 0 : i32
    return %c0_i32, %c0_i32_0 : i32, i32
  }
  func.func @transform_2(%arg0: i32) -> (i32, i32) {
    %c0_i32 = arith.constant 0 : i32
    %c0_i32_0 = arith.constant 0 : i32
    %c0_i32_1 = arith.constant 0 : i32
    return %c0_i32, %c0_i32_0 : i32, i32
  }
  func.func @transform_3(%arg0: i32) -> (i32, i32) {
    %c0_i32 = arith.constant 0 : i32
    %c0_i32_0 = arith.constant 0 : i32
    %c0_i32_1 = arith.constant 0 : i32
    return %c0_i32, %c0_i32_0 : i32, i32
  }
  func.func @transform_4(%arg0: i32) -> (i32, i32) {
    %c0_i32 = arith.constant 0 : i32
    %c0_i32_0 = arith.constant 0 : i32
    %c0_i32_1 = arith.constant 0 : i32
    return %c0_i32, %c0_i32_0 : i32, i32
  }
  func.func @transform_5(%arg0: i32) -> (i32, i32) {
    %c0_i32 = arith.constant 0 : i32
    %c0_i32_0 = arith.constant 0 : i32
    return %arg0, %c0_i32 : i32, i32
  }
}

</mosaic_0001>

<bundles_post_ra>
// kernel: net_forward.1
= control target key start
LH: loop header
LB: loop body
LE: loop exit
PB: predicated region body
PF: predicated region fallthrough
CT: control target
= control target key end

     0   :  { %s958_s18 = smov 0   ;;  %s1090_s0 = inlined_call_operand.vmem [shape: f32[256,16], index: 0, kind: input, shape index: {}]   ;;  %s1091_s1 = inlined_call_operand.vmem [shape: f32[16,32], index: 1, kind: input, shape index: {}]   ;;  %s1092_s2 = inlined_call_operand.vmem [shape: f32[1,32], index: 2, kind: input, shape index: {}]   ;;  %s1093_s3 = inlined_call_operand.vmem [shape: f32[32,8], index: 3, kind: input, shape index: {}]   ;;  %s1094_s4 = inlined_call_operand.vmem [shape: f32[1,8], index: 4, kind: input, shape index: {}]   ;;  %s1095_s5 = inlined_call_operand.vmem [shape: f32[256,8], index: 5, kind: output, shape index: {}]  }
   0x1 LB: > { %s757_s19 = sadd.s32 4294967295, %s926_s18   ;;  %p761_p0 = scmp.ge.s32.totalorder %s926_s18, 1  ;;  %s926_s18 = sphi %s958_s18, %s15_s18  }
   0x2   : > { %p188_p1 = scmp.lt.s32.totalorder %s926_s18, 3 }
   0x4   : > { %p189_p2 = pnand %p761_p0, %p188_p1 }
   0x5   : > { %v244_v0 = vld [vmem:[%s1091_s1] sm:$0xff] (!%p189_p2)  ;;  %v245_v1 = vld [vmem:[%s1091_s1 + $0x8] sm:$0xff] (!%p189_p2)  ;;  %s762_s24 = sshll.u32 (!%p189_p2), %s757_s19, 4  ;;  %vm253_vm0 = vcmask (!%p189_p2), 130048   ;;  %v465_v22 = vld [vmem:[%s1093_s3 + $0x10] sm:$0xff] (!%p189_p2)  ;;  %vm474_vm1 = vcmask (!%p189_p2), 261120  }
   0x6   : > { %192 = sbr.rel (%p189_p2) target bundleno = 482 (0x1e2), region = 40  ;;  %v463_v2 = vld [vmem:[%s1093_s3] sm:$0xff] (!%p189_p2)  ;;  %v900_v3 = vpack.c.bf16 (!%p189_p2), %v245_v1, %v244_v0  ;;  %p217_p3 = scmp.lt.s32.totalorder (!%p189_p2), %s762_s24, 31  ;;  %v464_v4 = vld [vmem:[%s1093_s3 + $0x8] sm:$0xff] (!%p189_p2)  ;;  %v466_v23 = vld [vmem:[%s1093_s3 + $0x18] sm:$0xff] (!%p189_p2)  ;;  %vm684_vm2 = vcmask (!%p189_p2), 64512  }
   0x7   : > { %v904_v5 = vpack.c.bf16 (!%p189_p2), %v464_v4, %v463_v2  ;;  %v908_v24 = vpack.c.bf16 (!%p189_p2), %v466_v23, %v465_v22  ;;  %v766_v25 = vld [vmem:[%s1092_s2] ss:$0 sm:$0xff] (!%p189_p2) }
   0x8   : > { %901 = vmatprep.subr.bf16.mxu0 (!%p189_p2), %v900_v3 }
   0x9   : > { %903 = vmatpush3.bf16.msra.mxu0 (!%p189_p2), %v900_v3  ;;  %905 = vmatprep.subr.bf16.mxu1 (!%p189_p2), %v904_v5 }
   0xa   : > { %907 = vmatpush3.bf16.msra.mxu1 (!%p189_p2), %v904_v5 }
   0xb   : > { %909 = vmatprep.subr.bf16.mxu1 (!%p189_p2), %v908_v24 }
   0xd   : > { %s1097_s24 = smov (!%p217_p3, %s762_s24), 31 }
   0xe   : > { %s763_s29 = sshll.u32 %s1097_s24, 3  ;;  %911 = vmatpush3.bf16.msra.mxu1 %v908_v24 }
   0xf   : > { %s986_s7 = scalar_lea.vmem %s1090_s0, %s763_s29  ;;  %s1053_s19 = scalar_lea.vmem %s1095_s5, %s763_s29 }
  0x10   : > { %v228_v6 = vld [vmem:[%s986_s7] sm:$0xff]  ;;  %v229_v7 = vld [vmem:[%s986_s7 + $0x8] sm:$0xff]  ;;  %v230_v8 = vld [vmem:[%s986_s7 + $0x10] sm:$0xff] }
  0x11   : > { %844 = vmatprep.mubr.msk.f32.mxu0 %vm253_vm0, %v228_v6  ;;  %v231_v9 = vld [vmem:[%s986_s7 + $0x18] sm:$0xff]  ;;  %v232_v10 = vld [vmem:[%s986_s7 + $0x20] sm:$0xff]  ;;  %v233_v11 = vld [vmem:[%s986_s7 + $0x28] sm:$0xff] }
  0x12   : > { %845 = vmatmul.mubr.msk.f32.vlgmr.msra.gmra.mrb[0].mxu0 %vm253_vm0, %v229_v7  ;;  %v234_v12 = vld [vmem:[%s986_s7 + $0x30] sm:$0xff]  ;;  %v235_v13 = vld [vmem:[%s986_s7 + $0x38] sm:$0xff]  ;;  %v236_v14 = vld [vmem:[%s986_s7 + $0x40] sm:$0xff] }
  0x13   : > { %847 = vmatprep.mubr.msk.f32.mxu0 %vm253_vm0, %v230_v8  ;;  %v237_v15 = vld [vmem:[%s986_s7 + $0x48] sm:$0xff]  ;;  %v238_v16 = vld [vmem:[%s986_s7 + $0x50] sm:$0xff]  ;;  %v239_v17 = vld [vmem:[%s986_s7 + $0x58] sm:$0xff] }
  0x14   : > { %v240_v18 = vld [vmem:[%s986_s7 + $0x60] sm:$0xff]  ;;  %v241_v19 = vld [vmem:[%s986_s7 + $0x68] sm:$0xff]  ;;  %v242_v20 = vld [vmem:[%s986_s7 + $0x70] sm:$0xff] }
  0x15   : > { %v243_v21 = vld [vmem:[%s986_s7 + $0x78] sm:$0xff] }
  0x16   : > { %848 = vmatmul.mubr.msk.f32.gmra.mrb[2].mxu0 %vm253_vm0, %v231_v9 }
  0x17   : > { %850 = vmatprep.mubr.msk.f32.mxu0 %vm253_vm0, %v232_v10  ;;  %v783_v10 = vld [vmem:[%s1094_s4] ss:$0 sm:$0xff] }
  0x1a   : > { %851 = vmatmul.mubr.msk.f32.gmra.mrb[4].mxu0 %vm253_vm0, %v233_v11 }
  0x1b   : > { %853 = vmatprep.mubr.msk.f32.mxu0 %vm253_vm0, %v234_v12 }
  0x1e   : > { %854 = vmatmul.mubr.msk.f32.gmra.mrb[6].mxu0 %vm253_vm0, %v235_v13 }
  0x1f   : > { %856 = vmatprep.mubr.msk.f32.mxu0 %vm253_vm0, %v236_v14 }
  0x22   : > { %857 = vmatmul.mubr.msk.f32.gmra.mrb[8].mxu0 %vm253_vm0, %v237_v15 }
  0x23   : > { %859 = vmatprep.mubr.msk.f32.mxu0 %vm253_vm0, %v238_v16 }
  0x26   : > { %860 = vmatmul.mubr.msk.f32.gmra.mrb[10].mxu0 %vm253_vm0, %v239_v17 }
  0x27   : > { %862 = vmatprep.mubr.msk.f32.mxu0 %vm253_vm0, %v240_v18 }
  0x2a   : > { %863 = vmatmul.mubr.msk.f32.gmra.mrb[12].mxu0 %vm253_vm0, %v241_v19 }
  0x2b   : > { %865 = vmatprep.mubr.msk.f32.mxu0 %vm253_vm0, %v242_v20 }
  0x2e   : > { %866 = vmatmul.mubr.msk.f32.gmra.mrb[14].mxu0 %vm253_vm0, %v243_v21 }
  0xe5   : > { %v846_v26 = vpop.f32.mrb[0].mxu0 }
  0xe6   : > { %v374_v27 = vadd.f32 %v846_v26, %v766_v25  ;;  %v368_v28 = vpop.f32.mrb[1].mxu0 }
  0xe7   : > { %v369_v29 = vadd.f32 %v766_v25, %v368_v28 }
  0xe8   : > { %v448_v32 = vmax.f32 %v374_v27, 0.0 }
  0xe9   : > { %v447_v30 = vmax.f32 %v369_v29, 0.0  ;;  %v849_v31 = vpop.f32.mrb[2].mxu0 }
  0xea   : > { %v384_v33 = vadd.f32 %v849_v31, %v766_v25  ;;  %v378_v34 = vpop.f32.mrb[3].mxu0 }
  0xeb   : > { %v379_v35 = vadd.f32 %v766_v25, %v378_v34  ;;  %876 = vmatprep.mubr.msk.f32.mxu1 %vm474_vm1, %v447_v30 }
  0xec   : > { %877 = vmatmul.mubr.msk.f32.vlgmr.msra.gmra.mrb[0].mxu1 %vm474_vm1, %v448_v32  ;;  %v450_v38 = vmax.f32 %v384_v33, 0.0 }
  0xed   : > { %v449_v36 = vmax.f32 %v379_v35, 0.0  ;;  %v852_v37 = vpop.f32.mrb[4].mxu0 }
  0xee   : > { %v394_v39 = vadd.f32 %v852_v37, %v766_v25  ;;  %v388_v40 = vpop.f32.mrb[5].mxu0 }
  0xef   : > { %v389_v41 = vadd.f32 %v766_v25, %v388_v40  ;;  %879 = vmatprep.mubr.msk.f32.mxu1 %vm474_vm1, %v449_v36 }
  0xf0   : > { %880 = vmatmul.mubr.msk.f32.gmra.mrb[2].mxu1 %vm474_vm1, %v450_v38  ;;  %v452_v44 = vmax.f32 %v394_v39, 0.0 }
  0xf1   : > { %v451_v42 = vmax.f32 %v389_v41, 0.0  ;;  %v855_v43 = vpop.f32.mrb[6].mxu0 }
  0xf2   : > { %v404_v45 = vadd.f32 %v855_v43, %v766_v25  ;;  %v398_v46 = vpop.f32.mrb[7].mxu0 }
  0xf3   : > { %v399_v47 = vadd.f32 %v766_v25, %v398_v46  ;;  %882 = vmatprep.mubr.msk.f32.mxu1 %vm474_vm1, %v451_v42 }
  0xf4   : > { %883 = vmatmul.mubr.msk.f32.gmra.mrb[4].mxu1 %vm474_vm1, %v452_v44  ;;  %v454_v50 = vmax.f32 %v404_v45, 0.0 }
  0xf5   : > { %v453_v48 = vmax.f32 %v399_v47, 0.0  ;;  %v858_v49 = vpop.f32.mrb[8].mxu0 }
  0xf6   : > { %v414_v51 = vadd.f32 %v858_v49, %v766_v25  ;;  %v408_v52 = vpop.f32.mrb[9].mxu0 }
  0xf7   : > { %v409_v53 = vadd.f32 %v766_v25, %v408_v52  ;;  %885 = vmatprep.mubr.msk.f32.mxu1 %vm474_vm1, %v453_v48 }
  0xf8   : > { %886 = vmatmul.mubr.msk.f32.gmra.mrb[6].mxu1 %vm474_vm1, %v454_v50  ;;  %v456_v56 = vmax.f32 %v414_v51, 0.0 }
  0xf9   : > { %v455_v54 = vmax.f32 %v409_v53, 0.0  ;;  %v861_v55 = vpop.f32.mrb[10].mxu0 }
  0xfa   : > { %v424_v57 = vadd.f32 %v861_v55, %v766_v25  ;;  %v418_v58 = vpop.f32.mrb[11].mxu0 }
  0xfb   : > { %v419_v59 = vadd.f32 %v766_v25, %v418_v58  ;;  %888 = vmatprep.mubr.msk.f32.mxu1 %vm474_vm1, %v455_v54 }
  0xfc   : > { %889 = vmatmul.mubr.msk.f32.gmra.mrb[8].mxu1 %vm474_vm1, %v456_v56  ;;  %v458_v62 = vmax.f32 %v424_v57, 0.0 }
  0xfd   : > { %v457_v60 = vmax.f32 %v419_v59, 0.0  ;;  %v864_v61 = vpop.f32.mrb[12].mxu0 }
  0xfe   : > { %v434_v63 = vadd.f32 %v864_v61, %v766_v25  ;;  %v428_v0 = vpop.f32.mrb[13].mxu0 }
  0xff   : > { %v429_v1 = vadd.f32 %v766_v25, %v428_v0  ;;  %891 = vmatprep.mubr.msk.f32.mxu1 %vm474_vm1, %v457_v60 }
 0x100   : > { %892 = vmatmul.mubr.msk.f32.gmra.mrb[10].mxu1 %vm474_vm1, %v458_v62  ;;  %v460_v4 = vmax.f32 %v434_v63, 0.0 }
 0x101   : > { %v459_v2 = vmax.f32 %v429_v1, 0.0  ;;  %v867_v3 = vpop.f32.mrb[14].mxu0 }
 0x102   : > { %v444_v5 = vadd.f32 %v867_v3, %v766_v25  ;;  %v438_v6 = vpop.f32.mrb[15].mxu0 }
 0x103   : > { %v439_v7 = vadd.f32 %v766_v25, %v438_v6  ;;  %894 = vmatprep.mubr.msk.f32.mxu1 %vm474_vm1, %v459_v2 }
 0x104   : > { %895 = vmatmul.mubr.msk.f32.gmra.mrb[12].mxu1 %vm474_vm1, %v460_v4  ;;  %v462_v9 = vmax.f32 %v444_v5, 0.0 }
 0x105   : > { %v461_v8 = vmax.f32 %v439_v7, 0.0 }
 0x107   : > { %897 = vmatprep.mubr.msk.f32.mxu1 %vm474_vm1, %v461_v8 }
 0x108   : > { %898 = vmatmul.mubr.msk.f32.gmra.mrb[14].mxu1 %vm474_vm1, %v462_v9 }
 0x1bf   : > { %v878_v11 = vpop.f32.mrb[0].mxu1 }
 0x1c0   : > { %v595_v12 = vadd.f32 %v878_v11, %v783_v10  ;;  %v589_v13 = vpop.f32.mrb[1].mxu1 }
 0x1c1   : > { %v590_v14 = vadd.f32 %v783_v10, %v589_v13 }
 0x1c2   : > { %v669_v15 = vmax.f32 %v595_v12, 0.0 }
 0x1c3   : > { %v668_v16 = vmax.f32 %v590_v14, 0.0  ;;  %v881_v17 = vpop.f32.mrb[2].mxu1 }
 0x1c4   : > { %686 = vst.msk [vmem:[%s1053_s19 + $0x8] sm:$0xff] %vm684_vm2, %v669_v15  ;;  %v605_v18 = vadd.f32 %v881_v17, %v783_v10  ;;  %v599_v19 = vpop.f32.mrb[3].mxu1 }
 0x1c5   : > { %685 = vst.msk [vmem:[%s1053_s19] sm:$0xff] %vm684_vm2, %v668_v16  ;;  %v600_v20 = vadd.f32 %v783_v10, %v599_v19 }
 0x1c6   : > { %v671_v21 = vmax.f32 %v605_v18, 0.0 }
 0x1c7   : > { %v670_v22 = vmax.f32 %v600_v20, 0.0  ;;  %v884_v23 = vpop.f32.mrb[4].mxu1 }
 0x1c8   : > { %688 = vst.msk [vmem:[%s1053_s19 + $0x18] sm:$0xff] %vm684_vm2, %v671_v21  ;;  %v615_v24 = vadd.f32 %v884_v23, %v783_v10  ;;  %v609_v25 = vpop.f32.mrb[5].mxu1 }
 0x1c9   : > { %687 = vst.msk [vmem:[%s1053_s19 + $0x10] sm:$0xff] %vm684_vm2, %v670_v22  ;;  %v610_v26 = vadd.f32 %v783_v10, %v609_v25 }
 0x1ca   : > { %v673_v27 = vmax.f32 %v615_v24, 0.0 }
 0x1cb   : > { %v672_v28 = vmax.f32 %v610_v26, 0.0  ;;  %v887_v29 = vpop.f32.mrb[6].mxu1 }
 0x1cc   : > { %690 = vst.msk [vmem:[%s1053_s19 + $0x28] sm:$0xff] %vm684_vm2, %v673_v27  ;;  %v625_v30 = vadd.f32 %v887_v29, %v783_v10  ;;  %v619_v31 = vpop.f32.mrb[7].mxu1 }
 0x1cd   : > { %689 = vst.msk [vmem:[%s1053_s19 + $0x20] sm:$0xff] %vm684_vm2, %v672_v28  ;;  %v620_v32 = vadd.f32 %v783_v10, %v619_v31 }
 0x1ce   : > { %v675_v33 = vmax.f32 %v625_v30, 0.0 }
 0x1cf   : > { %v674_v34 = vmax.f32 %v620_v32, 0.0  ;;  %v890_v35 = vpop.f32.mrb[8].mxu1 }
 0x1d0   : > { %692 = vst.msk [vmem:[%s1053_s19 + $0x38] sm:$0xff] %vm684_vm2, %v675_v33  ;;  %v635_v36 = vadd.f32 %v890_v35, %v783_v10  ;;  %v629_v37 = vpop.f32.mrb[9].mxu1 }
 0x1d1   : > { %691 = vst.msk [vmem:[%s1053_s19 + $0x30] sm:$0xff] %vm684_vm2, %v674_v34  ;;  %v630_v38 = vadd.f32 %v783_v10, %v629_v37 }
 0x1d2   : > { %v677_v39 = vmax.f32 %v635_v36, 0.0 }
 0x1d3   : > { %v676_v40 = vmax.f32 %v630_v38, 0.0  ;;  %v893_v41 = vpop.f32.mrb[10].mxu1 }
 0x1d4   : > { %694 = vst.msk [vmem:[%s1053_s19 + $0x48] sm:$0xff] %vm684_vm2, %v677_v39  ;;  %v645_v42 = vadd.f32 %v893_v41, %v783_v10  ;;  %v639_v43 = vpop.f32.mrb[11].mxu1 }
 0x1d5   : > { %693 = vst.msk [vmem:[%s1053_s19 + $0x40] sm:$0xff] %vm684_vm2, %v676_v40  ;;  %v640_v44 = vadd.f32 %v783_v10, %v639_v43 }
 0x1d6   : > { %v679_v45 = vmax.f32 %v645_v42, 0.0 }
 0x1d7   : > { %v678_v46 = vmax.f32 %v640_v44, 0.0  ;;  %v896_v47 = vpop.f32.mrb[12].mxu1 }
 0x1d8   : > { %696 = vst.msk [vmem:[%s1053_s19 + $0x58] sm:$0xff] %vm684_vm2, %v679_v45  ;;  %v655_v48 = vadd.f32 %v896_v47, %v783_v10  ;;  %v649_v49 = vpop.f32.mrb[13].mxu1 }
 0x1d9   : > { %695 = vst.msk [vmem:[%s1053_s19 + $0x50] sm:$0xff] %vm684_vm2, %v678_v46  ;;  %v650_v50 = vadd.f32 %v783_v10, %v649_v49 }
 0x1da   : > { %v681_v51 = vmax.f32 %v655_v48, 0.0 }
 0x1db   : > { %v680_v52 = vmax.f32 %v650_v50, 0.0  ;;  %v899_v53 = vpop.f32.mrb[14].mxu1 }
 0x1dc   : > { %698 = vst.msk [vmem:[%s1053_s19 + $0x68] sm:$0xff] %vm684_vm2, %v681_v51  ;;  %v665_v54 = vadd.f32 %v899_v53, %v783_v10  ;;  %v659_v55 = vpop.f32.mrb[15].mxu1 }
 0x1dd   : > { %697 = vst.msk [vmem:[%s1053_s19 + $0x60] sm:$0xff] %vm684_vm2, %v680_v52  ;;  %v660_v56 = vadd.f32 %v783_v10, %v659_v55 }
 0x1de   : > { %v683_v57 = vmax.f32 %v665_v54, 0.0 }
 0x1df   : > { %v682_v58 = vmax.f32 %v660_v56, 0.0 }
 0x1e0   : > { %700 = vst.msk [vmem:[%s1053_s19 + $0x78] sm:$0xff] %vm684_vm2, %v683_v57 }
 0x1e1   : > { %699 = vst.msk [vmem:[%s1053_s19 + $0x70] sm:$0xff] %vm684_vm2, %v682_v58 }
 0x1e2 PF: > { %s15_s18 = sadd.s32 1, %s926_s18  }
 0x1e3   : > { %p12_p4 = scmp.ge.s32.totalorder %s15_s18, 4  }
 0x1e5   :  { %14 = sbr.rel (!%p12_p4) target bundleno = 1 (0x1), region = 70 }

</bundles_post_ra>
